<compile_context>
chip_gen: v5e
topology: v5e:2x2
jax: 0.10.0
libtpu: 0.0.40
codegen_flags: <defaults>
</compile_context>

<pallas_src>
import math

import jax
import jax.numpy as jnp
from jax import lax
from jax.experimental import pallas as pl
from jax.experimental.pallas import tpu as pltpu

# ---------------- model hyper-parameters (small, consistent with the module) --
EMBED_DIM = 32
NUM_HEADS = 4
MLP_RATIO = 4.0
HIDDEN_DIM = int(EMBED_DIM * MLP_RATIO)   # 128
HEAD_DIM = EMBED_DIM // NUM_HEADS         # 8
SEQ = 8
BATCH = 2
N_TOK = SEQ * BATCH                       # 16 rows, (s, b) order, b fastest
LN_EPS = 1e-5
NEG_INF = -1e30


def _layernorm(x, w, b):
    mu = jnp.mean(x, axis=-1, keepdims=True)
    var = jnp.mean((x - mu) ** 2, axis=-1, keepdims=True)
    return (x - mu) * lax.rsqrt(var + LN_EPS) * w + b


def _gelu_exact(x):
    # nn.GELU() default = exact erf-based GELU
    return 0.5 * x * (1.0 + lax.erf(x * (1.0 / math.sqrt(2.0))))


def encoder_block_kernel(
    x_ref,                        # (N, E)   rows ordered (s, b), b fastest
    ln1w_ref, ln1b_ref,           # (1, E)
    wqT_ref, bq_ref,              # (E, E), (1, E)   -- 1/sqrt(D) folded in
    wkT_ref, bk_ref,              # (E, E), (1, E)
    wvT_ref, bv_ref,              # (E, E), (1, E)
    woT_ref, bo_ref,              # (E, E), (1, E)
    ln2w_ref, ln2b_ref,           # (1, E)
    w1T_ref, b1_ref,              # (E, H), (1, H)
    w2T_ref, b2_ref,              # (H, E), (1, E)
    head_mask_ref,                # (H*N, E)  0/1 per-head column mask
    attn_bias_ref,                # (H*N, N)  0 / -1e30 additive cross-batch mask
    o_ref,                        # (N, E)
):
    x = x_ref[...]                                      # (16, 32) f32

    # ---- x2 = norm1(x) -------------------------------------------------------
    x2 = _layernorm(x, ln1w_ref[...], ln1b_ref[...])

    # ---- Q/K/V projections (weights pre-transposed; scale folded into Q) ------
    q = jnp.dot(x2, wqT_ref[...], preferred_element_type=jnp.float32) + bq_ref[...]
    k = jnp.dot(x2, wkT_ref[...], preferred_element_type=jnp.float32) + bk_ref[...]
    v = jnp.dot(x2, wvT_ref[...], preferred_element_type=jnp.float32) + bv_ref[...]

    # ---- all heads at once: stack heads on the sublane axis -------------------
    head_mask = head_mask_ref[...]                                   # (64, 32)
    q_bd = jnp.concatenate([q] * NUM_HEADS, axis=0) * head_mask      # (64, 32)

    # scores for ALL heads/batches in one MXU push (qd,kd->qk, no K^T materialized)
    s = lax.dot_general(q_bd, k, (((1,), (1,)), ((), ())),
                        preferred_element_type=jnp.float32)          # (64, 16)
    s = s + attn_bias_ref[...]                                       # cross-batch mask

    # one masked softmax over all heads / batches
    s = s - jnp.max(s, axis=-1, keepdims=True)
    p = jnp.exp(s)                                                   # masked -> exactly 0
    p = p * pl.reciprocal(jnp.sum(p, axis=-1, keepdims=True), approx=False)

    # one PV matmul; keep each head's own V columns, fold head blocks back together
    pv = jnp.dot(p, v, preferred_element_type=jnp.float32) * head_mask   # (64, 32)
    concat = (pv[0 * N_TOK:1 * N_TOK] + pv[1 * N_TOK:2 * N_TOK]
              + pv[2 * N_TOK:3 * N_TOK] + pv[3 * N_TOK:4 * N_TOK])       # (16, 32)

    attn = jnp.dot(concat, woT_ref[...],
                   preferred_element_type=jnp.float32) + bo_ref[...]     # (16, 32)

    # ---- x = x + attn(...) ---------------------------------------------------
    x = x + attn

    # ---- x2 = norm2(x) -------------------------------------------------------
    x2 = _layernorm(x, ln2w_ref[...], ln2b_ref[...])

    # ---- MLP: Linear -> GELU -> (Dropout) -> Linear -> (Dropout) --------------
    h1 = jnp.dot(x2, w1T_ref[...], preferred_element_type=jnp.float32) + b1_ref[...]
    h2 = jnp.dot(_gelu_exact(h1), w2T_ref[...],
                 preferred_element_type=jnp.float32) + b2_ref[...]

    # ---- x = x + mlp(x2) -----------------------------------------------------
    o_ref[...] = x + h2
    # TODO(synk): dropout (p=0.1) is a no-op here (inference semantics); training-mode
    # dropout would need pltpu.prng_random_bits.


def prepare_params(params):
    """One-time host-side prep: split/transpose weights, fold the Q scale,
    and precompute the per-head column mask and additive cross-batch mask."""
    (ln1w, ln1b, wqkv, bqkv, wo, bo, ln2w, ln2b, w1, b1, w2, b2) = params
    scale = 1.0 / math.sqrt(HEAD_DIM)

    wq = wqkv[:EMBED_DIM]
    wk = wqkv[EMBED_DIM:2 * EMBED_DIM]
    wv = wqkv[2 * EMBED_DIM:]
    bq = bqkv[:, :EMBED_DIM] * scale
    bk = bqkv[:, EMBED_DIM:2 * EMBED_DIM]
    bv = bqkv[:, 2 * EMBED_DIM:]

    wqT = wq.T * scale
    wkT = wk.T
    wvT = wv.T
    woT = wo.T
    w1T = w1.T
    w2T = w2.T

    # per-head column mask (H*N, E): block h keeps only columns [h*D:(h+1)*D]
    row = jnp.arange(NUM_HEADS * N_TOK)[:, None]
    col = jnp.arange(EMBED_DIM)[None, :]
    head_mask = ((row // N_TOK) == (col // HEAD_DIM)).astype(jnp.float32)

    # additive cross-batch mask (H*N, N): 0 within batch, -1e30 across batches
    qb = (jnp.arange(NUM_HEADS * N_TOK)[:, None] % N_TOK) % BATCH
    kb = jnp.arange(N_TOK)[None, :] % BATCH
    attn_bias = jnp.where(qb == kb, 0.0, NEG_INF).astype(jnp.float32)

    return (ln1w, ln1b, wqT, bq, wkT, bk, wvT, bv, woT, bo,
            ln2w, ln2b, w1T, b1, w2T, b2, head_mask, attn_bias)


def transformer_encoder_block(x_sbe, kparams):
    """x_sbe: (S, B, E) — PyTorch nn.MultiheadAttention default layout.
    kparams: output of prepare_params."""
    S, B, E = x_sbe.shape
    N = S * B
    x2d = x_sbe.reshape(N, E)          # free reshape, no transpose anywhere

    flops = (3 * 2 * N * E * E                         # Q/K/V projections
             + 2 * (NUM_HEADS * N) * N * E * 2         # merged-head scores + PV
             + 2 * N * E * E                           # out projection
             + 2 * N * E * HIDDEN_DIM * 2)             # MLP fc1 + fc2
    transcendentals = NUM_HEADS * N * N + N * HIDDEN_DIM + 4 * N
    bytes_accessed = 4 * (2 * N * E + sum(int(p.size) for p in kparams))

    vmem = lambda: pl.BlockSpec(memory_space=pltpu.MemorySpace.VMEM)
    out = pl.pallas_call(
        encoder_block_kernel,
        out_shape=jax.ShapeDtypeStruct((N, E), jnp.float32),
        in_specs=[vmem() for _ in range(1 + len(kparams))],
        out_specs=vmem(),
        cost_estimate=pl.CostEstimate(flops=flops,
                                      transcendentals=transcendentals,
                                      bytes_accessed=bytes_accessed),
    )(x2d, *kparams)
    # TODO(synk): when stacking many encoder layers / token tiles, add a grid over
    # that axis (weights stacked on a leading dim, pipeline_mode=pl.Buffered(2)) to
    # amortize per-call overhead and, on v7x, shard it across both TensorCores with
    # dimension_semantics=("parallel", ...).
    return out.reshape(S, B, E)        # free reshape back to (S, B, E)


# ---------------- pure-JAX reference (same math) for a sanity check -----------
def reference(x_sbe, params):
    (ln1w, ln1b, wqkv, bqkv, wo, bo, ln2w, ln2b, w1, b1, w2, b2) = params
    x = jnp.transpose(x_sbe, (1, 0, 2))            # (B, S, E)
    x2 = _layernorm(x, ln1w[0], ln1b[0])
    qkv = jnp.einsum("bse,fe->bsf", x2, wqkv) + bqkv[0]
    q, k, v = jnp.split(qkv, 3, axis=-1)

    def split_heads(t):
        B_, S_, _ = t.shape
        return t.reshape(B_, S_, NUM_HEADS, HEAD_DIM).transpose(0, 2, 1, 3)

    qh, kh, vh = split_heads(q), split_heads(k), split_heads(v)
    s = jnp.einsum("bhqd,bhkd->bhqk", qh, kh) / math.sqrt(HEAD_DIM)
    p = jax.nn.softmax(s, axis=-1)
    a = jnp.einsum("bhqk,bhkd->bhqd", p, vh)
    a = a.transpose(0, 2, 1, 3).reshape(x.shape)
    attn = jnp.einsum("bse,fe->bsf", a, wo) + bo[0]
    x = x + attn
    x2 = _layernorm(x, ln2w[0], ln2b[0])
    h1 = jnp.einsum("bse,fe->bsf", x2, w1) + b1[0]
    h2 = jnp.einsum("bsf,ef->bse", _gelu_exact(h1), w2) + b2[0]
    return jnp.transpose(x + h2, (1, 0, 2))


def init_params(key):
    ks = jax.random.split(key, 8)
    scale = 0.05
    ln1w = jnp.ones((1, EMBED_DIM), jnp.float32)
    ln1b = jnp.zeros((1, EMBED_DIM), jnp.float32)
    wqkv = scale * jax.random.normal(ks[0], (3 * EMBED_DIM, EMBED_DIM), jnp.float32)
    bqkv = scale * jax.random.normal(ks[1], (1, 3 * EMBED_DIM), jnp.float32)
    wo = scale * jax.random.normal(ks[2], (EMBED_DIM, EMBED_DIM), jnp.float32)
    bo = scale * jax.random.normal(ks[3], (1, EMBED_DIM), jnp.float32)
    ln2w = jnp.ones((1, EMBED_DIM), jnp.float32)
    ln2b = jnp.zeros((1, EMBED_DIM), jnp.float32)
    w1 = scale * jax.random.normal(ks[4], (HIDDEN_DIM, EMBED_DIM), jnp.float32)
    b1 = scale * jax.random.normal(ks[5], (1, HIDDEN_DIM), jnp.float32)
    w2 = scale * jax.random.normal(ks[6], (EMBED_DIM, HIDDEN_DIM), jnp.float32)
    b2 = scale * jax.random.normal(ks[7], (1, EMBED_DIM), jnp.float32)
    return (ln1w, ln1b, wqkv, bqkv, wo, bo, ln2w, ln2b, w1, b1, w2, b2)


if __name__ == "__main__":
    key = jax.random.PRNGKey(0)
    kx, kp = jax.random.split(key)
    x = jax.random.normal(kx, (SEQ, BATCH, EMBED_DIM), jnp.float32)   # (S, B, E)
    params = init_params(kp)
    kparams = prepare_params(params)     # one-time host-side weight prep

    out = transformer_encoder_block(x, kparams)
    out = jax.block_until_ready(out)

    ref = jax.block_until_ready(reference(x, params))
    assert out.shape == (SEQ, BATCH, EMBED_DIM)
    assert jnp.allclose(out, ref, atol=1e-4, rtol=1e-4), "mismatch vs reference"

    print("KERNEL_OK")
</pallas_src>

<mosaic_0001>
module attributes {stable_mosaic.version = 11 : i64} {
  func.func @encoder_block_kernel(%arg0: memref<16x32xf32, #tpu.memory_space<vmem>>, %arg1: memref<1x32xf32, #tpu.memory_space<vmem>>, %arg2: memref<1x32xf32, #tpu.memory_space<vmem>>, %arg3: memref<32x32xf32, #tpu.memory_space<vmem>>, %arg4: memref<1x32xf32, #tpu.memory_space<vmem>>, %arg5: memref<32x32xf32, #tpu.memory_space<vmem>>, %arg6: memref<1x32xf32, #tpu.memory_space<vmem>>, %arg7: memref<32x32xf32, #tpu.memory_space<vmem>>, %arg8: memref<1x32xf32, #tpu.memory_space<vmem>>, %arg9: memref<32x32xf32, #tpu.memory_space<vmem>>, %arg10: memref<1x32xf32, #tpu.memory_space<vmem>>, %arg11: memref<1x32xf32, #tpu.memory_space<vmem>>, %arg12: memref<1x32xf32, #tpu.memory_space<vmem>>, %arg13: memref<32x128xf32, #tpu.memory_space<vmem>>, %arg14: memref<1x128xf32, #tpu.memory_space<vmem>>, %arg15: memref<128x32xf32, #tpu.memory_space<vmem>>, %arg16: memref<1x32xf32, #tpu.memory_space<vmem>>, %arg17: memref<64x32xf32, #tpu.memory_space<vmem>>, %arg18: memref<64x16xf32, #tpu.memory_space<vmem>>, %arg19: memref<16x32xf32, #tpu.memory_space<vmem>>) attributes {dimension_semantics = [], scalar_prefetch = 0 : i64, scratch_operands = 0 : i64, tpu.core_type = #tpu.core_type<tc>} {
    %c0 = arith.constant 0 : index
    %c0_0 = arith.constant 0 : index
    %0 = vector.load %arg0[%c0, %c0_0] : memref<16x32xf32, #tpu.memory_space<vmem>>, vector<16x32xf32>
    %c0_1 = arith.constant 0 : index
    %c0_2 = arith.constant 0 : index
    %1 = vector.load %arg1[%c0_1, %c0_2] : memref<1x32xf32, #tpu.memory_space<vmem>>, vector<1x32xf32>
    %c0_3 = arith.constant 0 : index
    %c0_4 = arith.constant 0 : index
    %2 = vector.load %arg2[%c0_3, %c0_4] : memref<1x32xf32, #tpu.memory_space<vmem>>, vector<1x32xf32>
    %cst = arith.constant dense<0.000000e+00> : vector<16xf32>
    %3 = vector.multi_reduction <add>, %0, %cst [1] : vector<16x32xf32> to vector<16xf32>
    %4 = vector.shape_cast %3 : vector<16xf32> to vector<16x1xf32>
    %cst_5 = arith.constant 3.200000e+01 : f32
    %5 = vector.broadcast %cst_5 : f32 to vector<16x1xf32>
    %6 = arith.divf %4, %5 : vector<16x1xf32>
    %7 = vector.broadcast %6 : vector<16x1xf32> to vector<16x32xf32>
    %8 = arith.subf %0, %7 : vector<16x32xf32>
    %9 = arith.mulf %8, %8 : vector<16x32xf32>
    %cst_6 = arith.constant dense<0.000000e+00> : vector<16xf32>
    %10 = vector.multi_reduction <add>, %9, %cst_6 [1] : vector<16x32xf32> to vector<16xf32>
    %11 = vector.shape_cast %10 : vector<16xf32> to vector<16x1xf32>
    %cst_7 = arith.constant 3.200000e+01 : f32
    %12 = vector.broadcast %cst_7 : f32 to vector<16x1xf32>
    %13 = arith.divf %11, %12 : vector<16x1xf32>
    %14 = vector.broadcast %6 : vector<16x1xf32> to vector<16x32xf32>
    %15 = arith.subf %0, %14 : vector<16x32xf32>
    %cst_8 = arith.constant 9.99999974E-6 : f32
    %16 = vector.broadcast %cst_8 : f32 to vector<16x1xf32>
    %17 = arith.addf %13, %16 : vector<16x1xf32>
    %18 = math.rsqrt %17 : vector<16x1xf32>
    %19 = vector.broadcast %18 : vector<16x1xf32> to vector<16x32xf32>
    %20 = arith.mulf %15, %19 : vector<16x32xf32>
    %21 = vector.broadcast %1 : vector<1x32xf32> to vector<16x32xf32>
    %22 = arith.mulf %20, %21 : vector<16x32xf32>
    %23 = vector.broadcast %2 : vector<1x32xf32> to vector<16x32xf32>
    %24 = arith.addf %22, %23 : vector<16x32xf32>
    %c0_9 = arith.constant 0 : index
    %c0_10 = arith.constant 0 : index
    %25 = vector.load %arg3[%c0_9, %c0_10] : memref<32x32xf32, #tpu.memory_space<vmem>>, vector<32x32xf32>
    %cst_11 = arith.constant dense<0.000000e+00> : vector<16x32xf32>
    %26 = tpu.matmul %24, %25, %cst_11 {dimension_numbers = #tpu.dot_dimension_numbers<[1], [0], [0], [1], [0, 0, 1, 1], [], []>} : vector<16x32xf32>, vector<32x32xf32>, vector<16x32xf32> -> vector<16x32xf32>
    %c0_12 = arith.constant 0 : index
    %c0_13 = arith.constant 0 : index
    %27 = vector.load %arg4[%c0_12, %c0_13] : memref<1x32xf32, #tpu.memory_space<vmem>>, vector<1x32xf32>
    %28 = vector.broadcast %27 : vector<1x32xf32> to vector<16x32xf32>
    %29 = arith.addf %26, %28 : vector<16x32xf32>
    %c0_14 = arith.constant 0 : index
    %c0_15 = arith.constant 0 : index
    %30 = vector.load %arg5[%c0_14, %c0_15] : memref<32x32xf32, #tpu.memory_space<vmem>>, vector<32x32xf32>
    %cst_16 = arith.constant dense<0.000000e+00> : vector<16x32xf32>
    %31 = tpu.matmul %24, %30, %cst_16 {dimension_numbers = #tpu.dot_dimension_numbers<[1], [0], [0], [1], [0, 0, 1, 1], [], []>} : vector<16x32xf32>, vector<32x32xf32>, vector<16x32xf32> -> vector<16x32xf32>
    %c0_17 = arith.constant 0 : index
    %c0_18 = arith.constant 0 : index
    %32 = vector.load %arg6[%c0_17, %c0_18] : memref<1x32xf32, #tpu.memory_space<vmem>>, vector<1x32xf32>
    %33 = vector.broadcast %32 : vector<1x32xf32> to vector<16x32xf32>
    %34 = arith.addf %31, %33 : vector<16x32xf32>
    %c0_19 = arith.constant 0 : index
    %c0_20 = arith.constant 0 : index
    %35 = vector.load %arg7[%c0_19, %c0_20] : memref<32x32xf32, #tpu.memory_space<vmem>>, vector<32x32xf32>
    %cst_21 = arith.constant dense<0.000000e+00> : vector<16x32xf32>
    %36 = tpu.matmul %24, %35, %cst_21 {dimension_numbers = #tpu.dot_dimension_numbers<[1], [0], [0], [1], [0, 0, 1, 1], [], []>} : vector<16x32xf32>, vector<32x32xf32>, vector<16x32xf32> -> vector<16x32xf32>
    %c0_22 = arith.constant 0 : index
    %c0_23 = arith.constant 0 : index
    %37 = vector.load %arg8[%c0_22, %c0_23] : memref<1x32xf32, #tpu.memory_space<vmem>>, vector<1x32xf32>
    %38 = vector.broadcast %37 : vector<1x32xf32> to vector<16x32xf32>
    %39 = arith.addf %36, %38 : vector<16x32xf32>
    %c0_24 = arith.constant 0 : index
    %c0_25 = arith.constant 0 : index
    %40 = vector.load %arg17[%c0_24, %c0_25] : memref<64x32xf32, #tpu.memory_space<vmem>>, vector<64x32xf32>
    %41 = tpu.concatenate %29, %29, %29, %29 in 0 : vector<16x32xf32>, vector<16x32xf32>, vector<16x32xf32>, vector<16x32xf32> -> vector<64x32xf32>
    %42 = arith.mulf %41, %40 : vector<64x32xf32>
    %cst_26 = arith.constant dense<0.000000e+00> : vector<64x16xf32>
    %43 = tpu.matmul %42, %34, %cst_26 {dimension_numbers = #tpu.dot_dimension_numbers<[1], [1], [0], [0], [0, 0, 1, 0], [], []>} : vector<64x32xf32>, vector<16x32xf32>, vector<64x16xf32> -> vector<64x16xf32>
    %c0_27 = arith.constant 0 : index
    %c0_28 = arith.constant 0 : index
    %44 = vector.load %arg18[%c0_27, %c0_28] : memref<64x16xf32, #tpu.memory_space<vmem>>, vector<64x16xf32>
    %45 = arith.addf %43, %44 : vector<64x16xf32>
    %cst_29 = arith.constant dense<0xFF800000> : vector<64xf32>
    %46 = vector.multi_reduction <maximumf>, %45, %cst_29 [1] : vector<64x16xf32> to vector<64xf32>
    %47 = vector.shape_cast %46 : vector<64xf32> to vector<64x1xf32>
    %48 = vector.broadcast %47 : vector<64x1xf32> to vector<64x16xf32>
    %49 = arith.subf %45, %48 : vector<64x16xf32>
    %50 = math.exp %49 : vector<64x16xf32>
    %cst_30 = arith.constant dense<0.000000e+00> : vector<64xf32>
    %51 = vector.multi_reduction <add>, %50, %cst_30 [1] : vector<64x16xf32> to vector<64xf32>
    %52 = vector.shape_cast %51 : vector<64xf32> to vector<64x1xf32>
    %53 = tpu.reciprocal %52 : vector<64x1xf32> -> vector<64x1xf32>
    %54 = vector.broadcast %53 : vector<64x1xf32> to vector<64x16xf32>
    %55 = arith.mulf %50, %54 : vector<64x16xf32>
    %cst_31 = arith.constant dense<0.000000e+00> : vector<64x32xf32>
    %56 = tpu.matmul %55, %39, %cst_31 {dimension_numbers = #tpu.dot_dimension_numbers<[1], [0], [0], [1], [0, 0, 1, 1], [], []>} : vector<64x16xf32>, vector<16x32xf32>, vector<64x32xf32> -> vector<64x32xf32>
    %57 = arith.mulf %56, %40 : vector<64x32xf32>
    %58 = vector.extract_strided_slice %57 {offsets = [0, 0], sizes = [16, 32], strides = [1, 1]} : vector<64x32xf32> to vector<16x32xf32>
    %59 = vector.extract_strided_slice %57 {offsets = [16, 0], sizes = [16, 32], strides = [1, 1]} : vector<64x32xf32> to vector<16x32xf32>
    %60 = arith.addf %58, %59 : vector<16x32xf32>
    %61 = vector.extract_strided_slice %57 {offsets = [32, 0], sizes = [16, 32], strides = [1, 1]} : vector<64x32xf32> to vector<16x32xf32>
    %62 = arith.addf %60, %61 : vector<16x32xf32>
    %63 = vector.extract_strided_slice %57 {offsets = [48, 0], sizes = [16, 32], strides = [1, 1]} : vector<64x32xf32> to vector<16x32xf32>
    %64 = arith.addf %62, %63 : vector<16x32xf32>
    %c0_32 = arith.constant 0 : index
    %c0_33 = arith.constant 0 : index
    %65 = vector.load %arg9[%c0_32, %c0_33] : memref<32x32xf32, #tpu.memory_space<vmem>>, vector<32x32xf32>
    %cst_34 = arith.constant dense<0.000000e+00> : vector<16x32xf32>
    %66 = tpu.matmul %64, %65, %cst_34 {dimension_numbers = #tpu.dot_dimension_numbers<[1], [0], [0], [1], [0, 0, 1, 1], [], []>} : vector<16x32xf32>, vector<32x32xf32>, vector<16x32xf32> -> vector<16x32xf32>
    %c0_35 = arith.constant 0 : index
    %c0_36 = arith.constant 0 : index
    %67 = vector.load %arg10[%c0_35, %c0_36] : memref<1x32xf32, #tpu.memory_space<vmem>>, vector<1x32xf32>
    %68 = vector.broadcast %67 : vector<1x32xf32> to vector<16x32xf32>
    %69 = arith.addf %66, %68 : vector<16x32xf32>
    %70 = arith.addf %0, %69 : vector<16x32xf32>
    %c0_37 = arith.constant 0 : index
    %c0_38 = arith.constant 0 : index
    %71 = vector.load %arg11[%c0_37, %c0_38] : memref<1x32xf32, #tpu.memory_space<vmem>>, vector<1x32xf32>
    %c0_39 = arith.constant 0 : index
    %c0_40 = arith.constant 0 : index
    %72 = vector.load %arg12[%c0_39, %c0_40] : memref<1x32xf32, #tpu.memory_space<vmem>>, vector<1x32xf32>
    %cst_41 = arith.constant dense<0.000000e+00> : vector<16xf32>
    %73 = vector.multi_reduction <add>, %70, %cst_41 [1] : vector<16x32xf32> to vector<16xf32>
    %74 = vector.shape_cast %73 : vector<16xf32> to vector<16x1xf32>
    %cst_42 = arith.constant 3.200000e+01 : f32
    %75 = vector.broadcast %cst_42 : f32 to vector<16x1xf32>
    %76 = arith.divf %74, %75 : vector<16x1xf32>
    %77 = vector.broadcast %76 : vector<16x1xf32> to vector<16x32xf32>
    %78 = arith.subf %70, %77 : vector<16x32xf32>
    %79 = arith.mulf %78, %78 : vector<16x32xf32>
    %cst_43 = arith.constant dense<0.000000e+00> : vector<16xf32>
    %80 = vector.multi_reduction <add>, %79, %cst_43 [1] : vector<16x32xf32> to vector<16xf32>
    %81 = vector.shape_cast %80 : vector<16xf32> to vector<16x1xf32>
    %cst_44 = arith.constant 3.200000e+01 : f32
    %82 = vector.broadcast %cst_44 : f32 to vector<16x1xf32>
    %83 = arith.divf %81, %82 : vector<16x1xf32>
    %84 = vector.broadcast %76 : vector<16x1xf32> to vector<16x32xf32>
    %85 = arith.subf %70, %84 : vector<16x32xf32>
    %cst_45 = arith.constant 9.99999974E-6 : f32
    %86 = vector.broadcast %cst_45 : f32 to vector<16x1xf32>
    %87 = arith.addf %83, %86 : vector<16x1xf32>
    %88 = math.rsqrt %87 : vector<16x1xf32>
    %89 = vector.broadcast %88 : vector<16x1xf32> to vector<16x32xf32>
    %90 = arith.mulf %85, %89 : vector<16x32xf32>
    %91 = vector.broadcast %71 : vector<1x32xf32> to vector<16x32xf32>
    %92 = arith.mulf %90, %91 : vector<16x32xf32>
    %93 = vector.broadcast %72 : vector<1x32xf32> to vector<16x32xf32>
    %94 = arith.addf %92, %93 : vector<16x32xf32>
    %c0_46 = arith.constant 0 : index
    %c0_47 = arith.constant 0 : index
    %95 = vector.load %arg13[%c0_46, %c0_47] : memref<32x128xf32, #tpu.memory_space<vmem>>, vector<32x128xf32>
    %cst_48 = arith.constant dense<0.000000e+00> : vector<16x128xf32>
    %96 = tpu.matmul %94, %95, %cst_48 {dimension_numbers = #tpu.dot_dimension_numbers<[1], [0], [0], [1], [0, 0, 1, 1], [], []>} : vector<16x32xf32>, vector<32x128xf32>, vector<16x128xf32> -> vector<16x128xf32>
    %c0_49 = arith.constant 0 : index
    %c0_50 = arith.constant 0 : index
    %97 = vector.load %arg14[%c0_49, %c0_50] : memref<1x128xf32, #tpu.memory_space<vmem>>, vector<1x128xf32>
    %98 = vector.broadcast %97 : vector<1x128xf32> to vector<16x128xf32>
    %99 = arith.addf %96, %98 : vector<16x128xf32>
    %cst_51 = arith.constant 5.000000e-01 : f32
    %100 = vector.broadcast %cst_51 : f32 to vector<16x128xf32>
    %101 = arith.mulf %100, %99 : vector<16x128xf32>
    %cst_52 = arith.constant 0.707106769 : f32
    %102 = vector.broadcast %cst_52 : f32 to vector<16x128xf32>
    %103 = arith.mulf %99, %102 : vector<16x128xf32>
    %104 = math.erf %103 : vector<16x128xf32>
    %cst_53 = arith.constant 1.000000e+00 : f32
    %105 = vector.broadcast %cst_53 : f32 to vector<16x128xf32>
    %106 = arith.addf %105, %104 : vector<16x128xf32>
    %107 = arith.mulf %101, %106 : vector<16x128xf32>
    %c0_54 = arith.constant 0 : index
    %c0_55 = arith.constant 0 : index
    %108 = vector.load %arg15[%c0_54, %c0_55] : memref<128x32xf32, #tpu.memory_space<vmem>>, vector<128x32xf32>
    %cst_56 = arith.constant dense<0.000000e+00> : vector<16x32xf32>
    %109 = tpu.matmul %107, %108, %cst_56 {dimension_numbers = #tpu.dot_dimension_numbers<[1], [0], [0], [1], [0, 0, 1, 1], [], []>} : vector<16x128xf32>, vector<128x32xf32>, vector<16x32xf32> -> vector<16x32xf32>
    %c0_57 = arith.constant 0 : index
    %c0_58 = arith.constant 0 : index
    %110 = vector.load %arg16[%c0_57, %c0_58] : memref<1x32xf32, #tpu.memory_space<vmem>>, vector<1x32xf32>
    %111 = vector.broadcast %110 : vector<1x32xf32> to vector<16x32xf32>
    %112 = arith.addf %109, %111 : vector<16x32xf32>
    %113 = arith.addf %70, %112 : vector<16x32xf32>
    %c0_59 = arith.constant 0 : index
    %c0_60 = arith.constant 0 : index
    %114 = vector.load %arg19[%c0_59, %c0_60] : memref<16x32xf32, #tpu.memory_space<vmem>>, vector<16x32xf32>
    tpu.vector_store %arg19[%c0_59, %c0_60], %113 {strides = array<i32>} : memref<16x32xf32, #tpu.memory_space<vmem>>, vector<16x32xf32>,
    return
  }
}

</mosaic_0001>

<bundles_post_ra>
// kernel: tpu_custom_call.1
= control target key start
LH: loop header
LB: loop body
LE: loop exit
PB: predicated region body
PF: predicated region fallthrough
CT: control target
= control target key end

     0   :  { %s1465_s0 = inlined_call_operand.vmem [shape: f32[16,32], index: 0, kind: input, shape index: {}]   ;;  %s1466_s1 = inlined_call_operand.vmem [shape: f32[1,32], index: 1, kind: input, shape index: {}]   ;;  %s1467_s2 = inlined_call_operand.vmem [shape: f32[1,32], index: 2, kind: input, shape index: {}]   ;;  %s1468_s3 = inlined_call_operand.vmem [shape: f32[32,32], index: 3, kind: input, shape index: {}]   ;;  %s1469_s4 = inlined_call_operand.vmem [shape: f32[1,32], index: 4, kind: input, shape index: {}]   ;;  %s1470_s5 = inlined_call_operand.vmem [shape: f32[32,32], index: 5, kind: input, shape index: {}]   ;;  %s1471_s6 = inlined_call_operand.vmem [shape: f32[1,32], index: 6, kind: input, shape index: {}]   ;;  %s1472_s7 = inlined_call_operand.vmem [shape: f32[32,32], index: 7, kind: input, shape index: {}]   ;;  %s1473_s8 = inlined_call_operand.vmem [shape: f32[1,32], index: 8, kind: input, shape index: {}]   ;;  %s1474_s9 = inlined_call_operand.vmem [shape: f32[32,32], index: 9, kind: input, shape index: {}]   ;;  %s1475_s10 = inlined_call_operand.vmem [shape: f32[1,32], index: 10, kind: input, shape index: {}]   ;;  %s1476_s11 = inlined_call_operand.vmem [shape: f32[1,32], index: 11, kind: input, shape index: {}]   ;;  %s1477_s12 = inlined_call_operand.vmem [shape: f32[1,32], index: 12, kind: input, shape index: {}]   ;;  %s1478_s13 = inlined_call_operand.vmem [shape: f32[32,128], index: 13, kind: input, shape index: {}]   ;;  %s1479_s14 = inlined_call_operand.vmem [shape: f32[1,128], index: 14, kind: input, shape index: {}]   ;;  %s1480_s15 = inlined_call_operand.vmem [shape: f32[128,32], index: 15, kind: input, shape index: {}]   ;;  %s1481_s16 = inlined_call_operand.vmem [shape: f32[1,32], index: 16, kind: input, shape index: {}]   ;;  %s1482_s17 = inlined_call_operand.vmem [shape: f32[64,32], index: 17, kind: input, shape index: {}]   ;;  %s1483_s18 = inlined_call_operand.vmem [shape: f32[64,16], index: 18, kind: input, shape index: {}]   ;;  %s1484_s19 = inlined_call_operand.hbm [shape: f32[16,32], index: 19, kind: output, shape index: {}]  }
   0x1   :  { %1487 = sst [smem:[#allocation5_spill]] %s1465_s0 }
   0x2   :  { %1488 = sst [smem:[#allocation6_spill]] %s1466_s1 }
   0x3   :  { %1489 = sst [smem:[#allocation7_spill]] %s1467_s2 }
   0x4   :  { %1490 = sst [smem:[#allocation8_spill]] %s1468_s3 }
   0x5   :  { %s1491_s20 = sld [smem:[#allocation5_spill]]  ;;  %vm67_vm0 = vcmask 261120  }
   0xb   :  { %v1107_v0 = vld [vmem:[%s1491_s20] sm:$0xff]  ;;  %v1114_v2 = vld [vmem:[%s1491_s20 + $0x8] sm:$0xff] }
   0xc   :  { %v68_v1 = vsel %vm67_vm0, %v1107_v0, 0.0 }
   0xd   :  { %69 = vadd.xlane.f32.xlu0 %v68_v1 }
   0xe   :  { %24 = vsyncpa [#allocation3], 0  ;;  %v71_v3 = vsel %vm67_vm0, %v1114_v2, 0.0  ;;  %v1000_v4 = vmov 32.0   ;;  %s1492_s23 = sld [smem:[#allocation8_spill]]  ;;  %v169_v22 = vld [vmem:[%s1470_s5 + $0x18] sm:$0xff] }
   0xf   :  { %928 = vrcp.f32 %v1000_v4  ;;  %186 = vmatpush.msra.mxu1 %v169_v22  ;;  %v168_v24 = vld [vmem:[%s1470_s5 + $0x10] sm:$0xff]  ;;  %v167_v26 = vld [vmem:[%s1470_s5 + $0x8] sm:$0xff]  ;;  %v166_v28 = vld [vmem:[%s1470_s5] sm:$0xff]  ;;  %s1493_s24 = sld [smem:[#allocation6_spill]]  ;;  %vm323_vm8 = vcmask 130048   ;;  %s1001_s21 = smov [#allocation2]  }
  0x10   :  { %s1494_s26 = sld [smem:[#allocation7_spill]]  ;;  %v200_v52 = vld [vmem:[%s1472_s7 + $0x18] sm:$0xff]  ;;  %v199_v54 = vld [vmem:[%s1472_s7 + $0x10] sm:$0xff]  ;;  %v198_v57 = vld [vmem:[%s1472_s7 + $0x8] sm:$0xff]  ;;  %s866_s1 = sshll.u32 %s1001_s21, 4  ;;  %s867_s1 = int_to_ptr.vmem [resolvable:$true] %s866_s1 }
  0x11   :  { %187 = vmatpush.msra.mxu1 %v168_v24  ;;  %v197_v59 = vld [vmem:[%s1472_s7] sm:$0xff]  ;;  %s868_s5 = sshll.u32 %s1484_s19, 4  ;;  %s869_s5 = int_to_ptr.hbm [resolvable:$true] %s868_s5 }
  0x12   :  { %v920_v63 = vld [vmem:[%s1471_s6] ss:$0 sm:$0xff] }
  0x13   :  { %188 = vmatpush.msra.mxu1 %v167_v26  ;;  %v921_v1 = vld [vmem:[%s1469_s4] ss:$0 sm:$0xff] }
  0x14   :  { %v132_v21 = vld [vmem:[%s1492_s23 + $0x18] sm:$0xff]  ;;  %v131_v23 = vld [vmem:[%s1492_s23 + $0x10] sm:$0xff]  ;;  %v130_v25 = vld [vmem:[%s1492_s23 + $0x8] sm:$0xff] }
  0x15   :  { %72 = vadd.xlane.f32.xlu0 %v71_v3  ;;  %v929_v5 = vpop.eup %928  ;;  %155 = vmatpush.msra.mxu2 %v132_v21  ;;  %v129_v27 = vld [vmem:[%s1492_s23] sm:$0xff]  ;;  %v1211_v21 = vld [vmem:[%s1482_s17 + $0x18] sm:$0xff]  ;;  %s1003_s23 = smov 8  }
  0x16   :  { %v75_v6 = vmul.f32 32.0, %v929_v5  ;;  %vm79_vm1 = vweird.f32 %v929_v5  ;;  %189 = vmatpush.msra.mxu1 %v166_v28  ;;  %v918_v43 = vld [vmem:[%s1493_s24] ss:$0 sm:$0xff] }
  0x17   :  { %156 = vmatpush.msra.mxu2 %v131_v23  ;;  %v919_v47 = vld [vmem:[%s1494_s26] ss:$0 sm:$0xff] }
  0x18   :  { %v76_v7 = vsub.f32 1.0, %v75_v6  ;;  %v1218_v23 = vld [vmem:[%s1482_s17 + $0x20] sm:$0xff] }
  0x19   :  { %157 = vmatpush.msra.mxu2 %v130_v25  ;;  %v1225_v25 = vld [vmem:[%s1482_s17 + $0x28] sm:$0xff] }
  0x1a   :  { %v77_v8 = vmul.f32 %v929_v5, %v76_v7 }
  0x1b   :  { %158 = vmatpush.msra.mxu2 %v129_v27  ;;  %v1232_v27 = vld [vmem:[%s1482_s17 + $0x30] sm:$0xff] }
  0x1c   :  { %v78_v9 = vadd.f32 %v929_v5, %v77_v8  ;;  %v1186_v8 = vld [vmem:[%s1482_s17] sm:$0xff] }
  0x1d   :  { %910 = vmatpush.msrb.mxu2 %v169_v22 }
  0x1e   :  { %v1118_v10 = vsel %vm79_vm1, %v929_v5, %v78_v9 }
  0x1f   :  { %911 = vmatpush.msrb.mxu2 %v168_v24 }
  0x21   :  { %912 = vmatpush.msrb.mxu2 %v167_v26 }
  0x23   :  { %913 = vmatpush.msrb.mxu2 %v166_v28 }
  0x80   :  { %v70_v11 = vpop.xlane.xlu0 %69 }
  0x81   :  { %v81_v12 = vmul.f32 %v1118_v10, %v70_v11 }
  0x83   :  { %v83_v13 = vsub.f32 %v1107_v0, %v81_v12 }
  0x85   :  { %v85_v14 = vmul.f32 %v83_v13, %v83_v13 }
  0x87   :  { %v87_v15 = vsel %vm67_vm0, %v85_v14, 0.0  ;;  %v922_v14 = vld [vmem:[%s1473_s8] ss:$0 sm:$0xff] }
  0x88   :  { %88 = vadd.xlane.f32.xlu1 %v87_v15  ;;  %v73_v16 = vpop.xlane.xlu0 %72 }
  0x89   :  { %v82_v17 = vmul.f32 %v1118_v10, %v73_v16 }
  0x8b   :  { %v84_v18 = vsub.f32 %v1114_v2, %v82_v17 }
  0x8d   :  { %v86_v19 = vmul.f32 %v84_v18, %v84_v18 }
  0x8f   :  { %v90_v20 = vsel %vm67_vm0, %v86_v19, 0.0  ;;  %v1204_v19 = vld [vmem:[%s1482_s17 + $0x10] sm:$0xff] }
  0x90   :  { %91 = vadd.xlane.f32.xlu1 %v90_v20 }
  0xfb   :  { %v89_v29 = vpop.xlane.xlu1 %88 }
  0xfc   :  { %v93_v30 = vmul.f32 %v89_v29, %v1118_v10  ;;  %v1239_v29 = vld [vmem:[%s1482_s17 + $0x38] sm:$0xff] }
  0xfe   :  { %v95_v31 = vadd.f32 1e-05, %v93_v30 }
 0x100   :  { %930 = vrsqrt.f32 %v95_v31  ;;  %vm103_vm3 = vweird.f32 %v95_v31 }
 0x103   :  { %v92_v32 = vpop.xlane.xlu1 %91 }
 0x104   :  { %v94_v33 = vmul.f32 %v92_v32, %v1118_v10 }
 0x106   :  { %v931_v34 = vpop.eup %930  ;;  %v96_v35 = vadd.f32 1e-05, %v94_v33 }
 0x107   :  { %v98_v36 = vmul.f32 %v931_v34, %v95_v31  ;;  %vm104_vm2 = vweird.f32 %v931_v34  ;;  %v244_v31 = vld [vmem:[%s1483_s18] sm:$0xff] }
 0x108   :  { %932 = vrsqrt.f32 %v96_v35  ;;  %vm105_vm4 = vmor %vm103_vm3, %vm104_vm2  ;;  %vm113_vm6 = vweird.f32 %v96_v35 }
 0x109   :  { %v99_v37 = vmul.f32 %v931_v34, %v98_v36 }
 0x10b   :  { %v100_v38 = vmul.f32 0.5, %v99_v37 }
 0x10d   :  { %v101_v39 = vsub.f32 1.5, %v100_v38 }
 0x10e   :  { %v933_v40 = vpop.eup %932 }
 0x10f   :  { %v102_v41 = vmul.f32 %v931_v34, %v101_v39  ;;  %v108_v42 = vmul.f32 %v933_v40, %v96_v35  ;;  %vm114_vm5 = vweird.f32 %v933_v40  ;;  %v245_v35 = vld [vmem:[%s1483_s18 + $0x8] sm:$0xff]  ;;  %v246_v39 = vld [vmem:[%s1483_s18 + $0x10] sm:$0xff] }
 0x110   :  { %vm115_vm7 = vmor %vm113_vm6, %vm114_vm5 }
 0x111   :  { %v106_v44 = vsel %vm105_vm4, %v931_v34, %v102_v41  ;;  %v109_v45 = vmul.f32 %v933_v40, %v108_v42 }
 0x112   :  { %v117_v46 = vmul.f32 %v106_v44, %v83_v13  ;;  %v1194_v13 = vld [vmem:[%s1482_s17 + $0x8] sm:$0xff] }
 0x113   :  { %v110_v48 = vmul.f32 0.5, %v109_v45 }
 0x114   :  { %v122_v49 = vmul.f32 %v918_v43, %v117_v46 }
 0x115   :  { %v111_v50 = vsub.f32 1.5, %v110_v48 }
 0x116   :  { %v127_v51 = vadd.f32 %v919_v47, %v122_v49 }
 0x117   :  { %v112_v53 = vmul.f32 %v933_v40, %v111_v50 }
 0x118   :  { %880 = vmatmul.msk.f32.vlgmr.msra.gmra.mxu2 %vm67_vm0, %v127_v51  ;;  %882 = vmatmul.msk.f32.vlgmr.msra.gmra.mxu1 %vm67_vm0, %v127_v51 }
 0x119   :  { %v116_v55 = vsel %vm115_vm7, %v933_v40, %v112_v53  ;;  %217 = vmatpush.msra.mxu2 %v200_v52 }
 0x11a   :  { %v118_v56 = vmul.f32 %v116_v55, %v84_v18  ;;  %v250_v55 = vld [vmem:[%s1483_s18 + $0x30] sm:$0xff] }
 0x11b   :  { %218 = vmatpush.msra.mxu2 %v199_v54 }
 0x11c   :  { %v123_v58 = vmul.f32 %v918_v43, %v118_v56  ;;  %v247_v43 = vld [vmem:[%s1483_s18 + $0x18] sm:$0xff] }
 0x11d   :  { %219 = vmatpush.msra.mxu2 %v198_v57 }
 0x11e   :  { %v128_v60 = vadd.f32 %v919_v47, %v123_v58  ;;  %v248_v47 = vld [vmem:[%s1483_s18 + $0x20] sm:$0xff] }
 0x11f   :  { %220 = vmatpush.msra.mxu2 %v197_v59  ;;  %v251_v59 = vld [vmem:[%s1483_s18 + $0x38] sm:$0xff] }
 0x120   :  { %881 = vmatmul.msk.f32.gmra.mxu2 %vm67_vm0, %v128_v60 }
 0x128   :  { %883 = vmatmul.msk.f32.vlgmr.msrb.gmra.mxu2 %vm67_vm0, %v128_v60 }
 0x130   :  { %884 = vmatmul.msk.f32.vlgmr.msra.gmra.mxu2 %vm67_vm0, %v127_v51  ;;  %v249_v51 = vld [vmem:[%s1483_s18 + $0x28] sm:$0xff] }
 0x138   :  { %885 = vmatmul.msk.f32.gmra.mxu2 %vm67_vm0, %v128_v60 }
 0x195   :  { %v191_v5 = vpop.f32.mrf.mxu1 }
 0x196   :  { %v192_v7 = vadd.f32 %v920_v63, %v191_v5 }
 0x19b   :  { %v160_v61 = vpop.f32.mrf.mxu2 }
 0x19c   :  { %v161_v6 = vadd.f32 %v921_v1, %v160_v61 }
 0x19e   :  { %v236_v11 = vmul.f32 %v1186_v8, %v161_v6  ;;  %v238_v20 = vmul.f32 %v1204_v19, %v161_v6  ;;  %v240_v24 = vmul.f32 %v1218_v23, %v161_v6  ;;  %v242_v28 = vmul.f32 %v1232_v27, %v161_v6 }
 0x1a3   :  { %v163_v62 = vpop.f32.mrf.mxu2 }
 0x1a4   :  { %v164_v12 = vadd.f32 %v921_v1, %v163_v62 }
 0x1a6   :  { %v237_v16 = vmul.f32 %v1194_v13, %v164_v12  ;;  %v239_v22 = vmul.f32 %v1211_v21, %v164_v12  ;;  %v241_v26 = vmul.f32 %v1225_v25, %v164_v12  ;;  %v243_v30 = vmul.f32 %v1239_v29, %v164_v12 }
 0x1ab   :  { %v194_v3 = vpop.f32.mrf.mxu2 }
 0x1ac   :  { %v195_v4 = vadd.f32 %v920_v63, %v194_v3 }
 0x1ae   :  { %886 = vmatpush.xpose.msk.msra.mxu3 %vm67_vm0, %v195_v4 }
 0x1b2   :  { %887 = vmatpush.xpose.msk.msra.mxu3 %vm67_vm0, %v192_v7 }
 0x1b3   :  { %v222_v9 = vpop.f32.mrf.mxu2 }
 0x1b4   :  { %v223_v18 = vadd.f32 %v922_v14, %v222_v9 }
 0x1b5   :  { %888 = vmatmul.msk.f32.vlgmr.msra.gmra.mxu3 %vm67_vm0, %v236_v11 }
 0x1bb   :  { %v225_v15 = vpop.f32.mrf.mxu2 }
 0x1bc   :  { %v226_v17 = vadd.f32 %v922_v14, %v225_v15 }
 0x1bd   :  { %889 = vmatmul.msk.f32.gmra.mxu3 %vm67_vm0, %v237_v16 }
 0x1be   :  { %554 = vmatpush.msra.mxu0 %v226_v17 }
 0x1c0   :  { %555 = vmatpush.msra.mxu0 %v223_v18 }
 0x1c5   :  { %890 = vmatmul.msk.f32.gmra.mxu3 %vm67_vm0, %v238_v20 }
 0x1cd   :  { %891 = vmatmul.msk.f32.gmra.mxu3 %vm67_vm0, %v239_v22 }
 0x1d5   :  { %892 = vmatmul.msk.f32.gmra.mxu3 %vm67_vm0, %v240_v24 }
 0x1dd   :  { %893 = vmatmul.msk.f32.gmra.mxu3 %vm67_vm0, %v241_v26 }
 0x1e5   :  { %894 = vmatmul.msk.f32.gmra.mxu3 %vm67_vm0, %v242_v28 }
 0x1ed   :  { %895 = vmatmul.msk.f32.gmra.mxu3 %vm67_vm0, %v243_v30 }
 0x238   :  { %v299_v32 = vpop.f32.mrf.mxu3 }
 0x239   :  { %v300_v33 = vadd.f32 %v299_v32, %v244_v31 }
 0x23b   :  { %v324_v34 = vsel %vm323_vm8, %v300_v33, -inf }
 0x23c   :  { %325 = vmax.xlane.f32.xlu2 %v324_v34 }
 0x240   :  { %v302_v36 = vpop.f32.mrf.mxu3 }
 0x241   :  { %v303_v37 = vadd.f32 %v302_v36, %v245_v35 }
 0x243   :  { %v327_v38 = vsel %vm323_vm8, %v303_v37, -inf }
 0x244   :  { %328 = vmax.xlane.f32.xlu2 %v327_v38 }
 0x248   :  { %v305_v40 = vpop.f32.mrf.mxu3 }
 0x249   :  { %v306_v41 = vadd.f32 %v305_v40, %v246_v39 }
 0x24b   :  { %v330_v42 = vsel %vm323_vm8, %v306_v41, -inf }
 0x24c   :  { %331 = vmax.xlane.f32.xlu0 %v330_v42 }
 0x250   :  { %v308_v44 = vpop.f32.mrf.mxu3 }
 0x251   :  { %v309_v45 = vadd.f32 %v308_v44, %v247_v43 }
 0x253   :  { %v333_v46 = vsel %vm323_vm8, %v309_v45, -inf }
 0x254   :  { %334 = vmax.xlane.f32.xlu1 %v333_v46 }
 0x258   :  { %v311_v48 = vpop.f32.mrf.mxu3 }
 0x259   :  { %v312_v49 = vadd.f32 %v311_v48, %v248_v47 }
 0x25b   :  { %v336_v50 = vsel %vm323_vm8, %v312_v49, -inf }
 0x25c   :  { %337 = vmax.xlane.f32.xlu2 %v336_v50 }
 0x260   :  { %v314_v52 = vpop.f32.mrf.mxu3 }
 0x261   :  { %v315_v53 = vadd.f32 %v314_v52, %v249_v51 }
 0x263   :  { %v339_v54 = vsel %vm323_vm8, %v315_v53, -inf }
 0x264   :  { %340 = vmax.xlane.f32.xlu0 %v339_v54 }
 0x268   :  { %v317_v56 = vpop.f32.mrf.mxu3 }
 0x269   :  { %v318_v57 = vadd.f32 %v317_v56, %v250_v55 }
 0x26b   :  { %v342_v58 = vsel %vm323_vm8, %v318_v57, -inf }
 0x26c   :  { %343 = vmax.xlane.f32.xlu1 %v342_v58 }
 0x270   :  { %v320_v60 = vpop.f32.mrf.mxu3 }
 0x271   :  { %v321_v61 = vadd.f32 %v320_v60, %v251_v59 }
 0x273   :  { %v345_v62 = vsel %vm323_vm8, %v321_v61, -inf }
 0x274   :  { %346 = vmax.xlane.f32.xlu0 %v345_v62 }
 0x2af   :  { %v326_v63 = vpop.xlane.xlu2 %325 }
 0x2b0   :  { %v348_v1 = vsub.f32 %v300_v33, %v326_v63 }
 0x2b2   :  { %v356_v3 = vmul.f32 1.442695, %v348_v1 }
 0x2b4   :  { %934 = vpow2.f32 %v356_v3 }
 0x2b7   :  { %v329_v4 = vpop.xlane.xlu2 %328 }
 0x2b8   :  { %v349_v5 = vsub.f32 %v303_v37, %v329_v4 }
 0x2ba   :  { %v1275_v6 = vpop.eup %934  ;;  %v358_v7 = vmul.f32 1.442695, %v349_v5 }
 0x2bb   :  { %v372_v9 = vsel %vm323_vm8, %v1275_v6, 0.0 }
 0x2bc   :  { %936 = vpow2.f32 %v358_v7  ;;  %373 = vadd.xlane.f32.xlu2 %v372_v9 }
 0x2bf   :  { %v332_v11 = vpop.xlane.xlu0 %331 }
 0x2c0   :  { %v350_v12 = vsub.f32 %v306_v41, %v332_v11 }
 0x2c2   :  { %v1279_v14 = vpop.eup %936  ;;  %v360_v15 = vmul.f32 1.442695, %v350_v12 }
 0x2c3   :  { %v375_v16 = vsel %vm323_vm8, %v1279_v14, 0.0 }
 0x2c4   :  { %938 = vpow2.f32 %v360_v15  ;;  %376 = vadd.xlane.f32.xlu1 %v375_v16 }
 0x2c7   :  { %v335_v17 = vpop.xlane.xlu1 %334 }
 0x2c8   :  { %v351_v18 = vsub.f32 %v309_v45, %v335_v17 }
 0x2ca   :  { %v1283_v20 = vpop.eup %938  ;;  %v362_v22 = vmul.f32 1.442695, %v351_v18 }
 0x2cb   :  { %v378_v24 = vsel %vm323_vm8, %v1283_v20, 0.0 }
 0x2cc   :  { %940 = vpow2.f32 %v362_v22  ;;  %379 = vadd.xlane.f32.xlu2 %v378_v24 }
 0x2cf   :  { %v338_v26 = vpop.xlane.xlu2 %337 }
 0x2d0   :  { %v352_v28 = vsub.f32 %v312_v49, %v338_v26 }
 0x2d2   :  { %v1287_v30 = vpop.eup %940  ;;  %v364_v31 = vmul.f32 1.442695, %v352_v28 }
 0x2d3   :  { %v381_v32 = vsel %vm323_vm8, %v1287_v30, 0.0 }
 0x2d4   :  { %942 = vpow2.f32 %v364_v31  ;;  %382 = vadd.xlane.f32.xlu0 %v381_v32 }
 0x2d7   :  { %v341_v33 = vpop.xlane.xlu0 %340 }
 0x2d8   :  { %v353_v34 = vsub.f32 %v315_v53, %v341_v33 }
 0x2da   :  { %v1291_v35 = vpop.eup %942  ;;  %v366_v36 = vmul.f32 1.442695, %v353_v34 }
 0x2db   :  { %v384_v37 = vsel %vm323_vm8, %v1291_v35, 0.0 }
 0x2dc   :  { %944 = vpow2.f32 %v366_v36  ;;  %385 = vadd.xlane.f32.xlu1 %v384_v37 }
 0x2df   :  { %v344_v38 = vpop.xlane.xlu1 %343 }
 0x2e0   :  { %v354_v39 = vsub.f32 %v318_v57, %v344_v38 }
 0x2e2   :  { %v1295_v40 = vpop.eup %944  ;;  %v368_v41 = vmul.f32 1.442695, %v354_v39 }
 0x2e3   :  { %v387_v42 = vsel %vm323_vm8, %v1295_v40, 0.0 }
 0x2e4   :  { %946 = vpow2.f32 %v368_v41  ;;  %388 = vadd.xlane.f32.xlu2 %v387_v42 }
 0x2e7   :  { %v347_v43 = vpop.xlane.xlu0 %346 }
 0x2e8   :  { %v355_v44 = vsub.f32 %v321_v61, %v347_v43 }
 0x2ea   :  { %v1299_v45 = vpop.eup %946  ;;  %v370_v46 = vmul.f32 1.442695, %v355_v44 }
 0x2eb   :  { %v390_v47 = vsel %vm323_vm8, %v1299_v45, 0.0 }
 0x2ec   :  { %948 = vpow2.f32 %v370_v46  ;;  %391 = vadd.xlane.f32.xlu0 %v390_v47 }
 0x2f2   :  { %v1303_v48 = vpop.eup %948 }
 0x2f3   :  { %v393_v49 = vsel %vm323_vm8, %v1303_v48, 0.0 }
 0x2f4   :  { %394 = vadd.xlane.f32.xlu1 %v393_v49 }
 0x32f   :  { %v374_v50 = vpop.xlane.xlu2 %373 }
 0x330   :  { %950 = vrcp.f32 %v374_v50  ;;  %v407_v55 = vand.u32 2147483648, %v374_v50  ;;  %v405_v57 = vand.u32 2147483647, %v374_v50  ;;  %vm401_vm10 = vweird.f32 %v374_v50 }
 0x332   :  { %v408_v60 = vor.u32 1.1754944e-38, %v407_v55  ;;  %vm406_vm12 = vcmp.eq.f32.partialorder %v405_v57, 8.507059e+37 }
 0x336   :  { %v951_v51 = vpop.eup %950 }
 0x337   :  { %v397_v52 = vmul.f32 %v951_v51, %v374_v50  ;;  %v377_v53 = vpop.xlane.xlu1 %376  ;;  %vm402_vm9 = vweird.f32 %v951_v51 }
 0x338   :  { %952 = vrcp.f32 %v377_v53  ;;  %vm403_vm11 = vmor %vm401_vm10, %vm402_vm9  ;;  %v421_v5 = vand.u32 2147483648, %v377_v53  ;;  %v419_v9 = vand.u32 2147483647, %v377_v53  ;;  %vm415_vm14 = vweird.f32 %v377_v53 }
 0x339   :  { %v398_v54 = vsub.f32 1.0, %v397_v52 }
 0x33a   :  { %v422_v15 = vor.u32 1.1754944e-38, %v421_v5  ;;  %vm420_vm1 = vcmp.eq.f32.partialorder %v419_v9, 8.507059e+37 }
 0x33b   :  { %v399_v56 = vmul.f32 %v951_v51, %v398_v54 }
 0x33d   :  { %v400_v58 = vadd.f32 %v951_v51, %v399_v56 }
 0x33e   :  { %v953_v59 = vpop.eup %952 }
 0x33f   :  { %v411_v61 = vmul.f32 %v953_v59, %v377_v53  ;;  %v380_v62 = vpop.xlane.xlu2 %379  ;;  %v404_v63 = vsel %vm403_vm11, %v951_v51, %v400_v58  ;;  %vm416_vm13 = vweird.f32 %v953_v59 }
 0x340   :  { %954 = vrcp.f32 %v380_v62  ;;  %v409_v1 = vsel %vm406_vm12, %v408_v60, %v404_v63  ;;  %vm417_vm15 = vmor %vm415_vm14, %vm416_vm13  ;;  %v435_v26 = vand.u32 2147483648, %v380_v62  ;;  %v433_v31 = vand.u32 2147483647, %v380_v62 }
 0x341   :  { %v412_v3 = vsub.f32 1.0, %v411_v61  ;;  %v508_v4 = vmul.f32 %v1275_v6, %v409_v1  ;;  %vm429_vm3 = vweird.f32 %v380_v62 }
 0x342   :  { %v436_v34 = vor.u32 1.1754944e-38, %v435_v26  ;;  %vm434_vm5 = vcmp.eq.f32.partialorder %v433_v31, 8.507059e+37 }
 0x343   :  { %v413_v7 = vmul.f32 %v953_v59, %v412_v3  ;;  %896 = vmatmul.msk.f32.vlgmr.msra.gmra.mxu0 %vm323_vm8, %v508_v4 }
 0x345   :  { %v414_v11 = vadd.f32 %v953_v59, %v413_v7 }
 0x346   :  { %v955_v12 = vpop.eup %954 }
 0x347   :  { %v425_v16 = vmul.f32 %v955_v12, %v380_v62  ;;  %v383_v17 = vpop.xlane.xlu0 %382  ;;  %v418_v18 = vsel %vm417_vm15, %v953_v59, %v414_v11  ;;  %vm430_vm2 = vweird.f32 %v955_v12 }
 0x348   :  { %956 = vrcp.f32 %v383_v17  ;;  %v423_v22 = vsel %vm420_vm1, %v422_v15, %v418_v18  ;;  %vm431_vm4 = vmor %vm429_vm3, %vm430_vm2  ;;  %v449_v42 = vand.u32 2147483648, %v383_v17  ;;  %v447_v44 = vand.u32 2147483647, %v383_v17 }
 0x349   :  { %v426_v24 = vsub.f32 1.0, %v425_v16  ;;  %v509_v6 = vmul.f32 %v1279_v14, %v423_v22  ;;  %vm443_vm7 = vweird.f32 %v383_v17 }
 0x34a   :  { %v450_v49 = vor.u32 1.1754944e-38, %v449_v42  ;;  %vm448_vm10 = vcmp.eq.f32.partialorder %v447_v44, 8.507059e+37 }
 0x34b   :  { %v427_v28 = vmul.f32 %v955_v12, %v426_v24  ;;  %897 = vmatmul.msk.f32.gmra.mxu0 %vm323_vm8, %v509_v6 }
 0x34d   :  { %v428_v32 = vadd.f32 %v955_v12, %v427_v28 }
 0x34e   :  { %v957_v33 = vpop.eup %956 }
 0x34f   :  { %v439_v36 = vmul.f32 %v957_v33, %v383_v17  ;;  %v386_v37 = vpop.xlane.xlu1 %385  ;;  %v432_v38 = vsel %vm431_vm4, %v955_v12, %v428_v32  ;;  %vm444_vm6 = vweird.f32 %v957_v33 }
 0x350   :  { %958 = vrcp.f32 %v386_v37  ;;  %v437_v39 = vsel %vm434_vm5, %v436_v34, %v432_v38  ;;  %vm445_vm9 = vmor %vm443_vm7, %vm444_vm6  ;;  %v463_v55 = vand.u32 2147483648, %v386_v37  ;;  %v461_v57 = vand.u32 2147483647, %v386_v37 }
 0x351   :  { %v440_v41 = vsub.f32 1.0, %v439_v36  ;;  %v510_v14 = vmul.f32 %v1283_v20, %v437_v39  ;;  %vm457_vm12 = vweird.f32 %v386_v37 }
 0x352   :  { %v464_v60 = vor.u32 1.1754944e-38, %v463_v55  ;;  %vm462_vm14 = vcmp.eq.f32.partialorder %v461_v57, 8.507059e+37 }
 0x353   :  { %v441_v43 = vmul.f32 %v957_v33, %v440_v41  ;;  %898 = vmatmul.msk.f32.gmra.mxu0 %vm323_vm8, %v510_v14 }
 0x355   :  { %v442_v46 = vadd.f32 %v957_v33, %v441_v43 }
 0x356   :  { %v959_v47 = vpop.eup %958 }
 0x357   :  { %v453_v50 = vmul.f32 %v959_v47, %v386_v37  ;;  %v389_v51 = vpop.xlane.xlu2 %388  ;;  %v446_v52 = vsel %vm445_vm9, %v957_v33, %v442_v46  ;;  %vm458_vm11 = vweird.f32 %v959_v47 }
 0x358   :  { %960 = vrcp.f32 %v389_v51  ;;  %v451_v53 = vsel %vm448_vm10, %v450_v49, %v446_v52  ;;  %vm459_vm13 = vmor %vm457_vm12, %vm458_vm11  ;;  %v477_v4 = vand.u32 2147483648, %v389_v51  ;;  %v475_v7 = vand.u32 2147483647, %v389_v51  ;;  %v596_v52 = vld [vmem:[%s1474_s9 + $0x8] sm:$0xff] }
 0x359   :  { %v454_v54 = vsub.f32 1.0, %v453_v50  ;;  %v511_v20 = vmul.f32 %v1287_v30, %v451_v53  ;;  %vm471_vm1 = vweird.f32 %v389_v51  ;;  %v597_v50 = vld [vmem:[%s1474_s9 + $0x10] sm:$0xff] }
 0x35a   :  { %v478_v12 = vor.u32 1.1754944e-38, %v477_v4  ;;  %vm476_vm3 = vcmp.eq.f32.partialorder %v475_v7, 8.507059e+37 }
 0x35b   :  { %v455_v56 = vmul.f32 %v959_v47, %v454_v54  ;;  %899 = vmatmul.msk.f32.gmra.mxu0 %vm323_vm8, %v511_v20 }
 0x35d   :  { %v456_v58 = vadd.f32 %v959_v47, %v455_v56 }
 0x35e   :  { %v961_v59 = vpop.eup %960 }
 0x35f   :  { %v467_v61 = vmul.f32 %v961_v59, %v389_v51  ;;  %v392_v62 = vpop.xlane.xlu0 %391  ;;  %v460_v63 = vsel %vm459_vm13, %v959_v47, %v456_v58  ;;  %vm472_vm15 = vweird.f32 %v961_v59 }
 0x360   :  { %962 = vrcp.f32 %v392_v62  ;;  %v465_v1 = vsel %vm462_vm14, %v464_v60, %v460_v63  ;;  %vm473_vm2 = vmor %vm471_vm1, %vm472_vm15  ;;  %v491_v24 = vand.u32 2147483648, %v392_v62  ;;  %v489_v26 = vand.u32 2147483647, %v392_v62 }
 0x361   :  { %v468_v3 = vsub.f32 1.0, %v467_v61  ;;  %v512_v30 = vmul.f32 %v1291_v35, %v465_v1  ;;  %vm485_vm5 = vweird.f32 %v392_v62 }
 0x362   :  { %v492_v32 = vor.u32 1.1754944e-38, %v491_v24  ;;  %vm490_vm7 = vcmp.eq.f32.partialorder %v489_v26, 8.507059e+37  ;;  %v692_v26 = vld [vmem:[%s1478_s13 + $0x10] sm:$0xff] }
 0x363   :  { %v469_v5 = vmul.f32 %v961_v59, %v468_v3  ;;  %900 = vmatmul.msk.f32.gmra.mxu0 %vm323_vm8, %v512_v30 }
 0x365   :  { %v470_v9 = vadd.f32 %v961_v59, %v469_v5 }
 0x366   :  { %v963_v11 = vpop.eup %962 }
 0x367   :  { %v481_v15 = vmul.f32 %v963_v11, %v392_v62  ;;  %v395_v16 = vpop.xlane.xlu1 %394  ;;  %v474_v17 = vsel %vm473_vm2, %v961_v59, %v470_v9  ;;  %vm486_vm4 = vweird.f32 %v963_v11 }
 0x368   :  { %964 = vrcp.f32 %v395_v16  ;;  %v479_v18 = vsel %vm476_vm3, %v478_v12, %v474_v17  ;;  %vm487_vm6 = vmor %vm485_vm5, %vm486_vm4  ;;  %v505_v39 = vand.u32 2147483648, %v395_v16  ;;  %v503_v41 = vand.u32 2147483647, %v395_v16 }
 0x369   :  { %v482_v22 = vsub.f32 1.0, %v481_v15  ;;  %v513_v35 = vmul.f32 %v1295_v40, %v479_v18  ;;  %vm499_vm10 = vweird.f32 %v395_v16 }
 0x36a   :  { %v506_v42 = vor.u32 1.1754944e-38, %v505_v39  ;;  %vm504_vm12 = vcmp.eq.f32.partialorder %v503_v41, 8.507059e+37 }
 0x36b   :  { %v483_v6 = vmul.f32 %v963_v11, %v482_v22  ;;  %901 = vmatmul.msk.f32.gmra.mxu0 %vm323_vm8, %v513_v35 }
 0x36d   :  { %v484_v28 = vadd.f32 %v963_v11, %v483_v6  ;;  %v693_v6 = vld [vmem:[%s1478_s13 + $0x18] sm:$0xff] }
 0x36e   :  { %v965_v31 = vpop.eup %964  ;;  %716 = vmatpush.msrb.mxu2 %v693_v6 }
 0x36f   :  { %v495_v33 = vmul.f32 %v965_v31, %v395_v16  ;;  %v488_v34 = vsel %vm487_vm6, %v963_v11, %v484_v28  ;;  %vm500_vm9 = vweird.f32 %v965_v31  ;;  %v691_v28 = vld [vmem:[%s1478_s13 + $0x8] sm:$0xff] }
 0x370   :  { %v493_v36 = vsel %vm490_vm7, %v492_v32, %v488_v34  ;;  %vm501_vm11 = vmor %vm499_vm10, %vm500_vm9  ;;  %717 = vmatpush.msrb.mxu2 %v692_v26 }
 0x371   :  { %v496_v37 = vsub.f32 1.0, %v495_v33  ;;  %v514_v38 = vmul.f32 %v1299_v45, %v493_v36  ;;  %v598_v45 = vld [vmem:[%s1474_s9 + $0x18] sm:$0xff] }
 0x372   :  { %621 = vmatpush.msrb.mxu1 %v598_v45  ;;  %718 = vmatpush.msrb.mxu2 %v691_v28 }
 0x373   :  { %v497_v40 = vmul.f32 %v965_v31, %v496_v37  ;;  %902 = vmatmul.msk.f32.gmra.mxu0 %vm323_vm8, %v514_v38 }
 0x374   :  { %622 = vmatpush.msrb.mxu1 %v597_v50  ;;  %v925_v50 = vld [vmem:[%s1477_s12] ss:$0 sm:$0xff] }
 0x375   :  { %v498_v14 = vadd.f32 %v965_v31, %v497_v40 }
 0x376   :  { %623 = vmatpush.msrb.mxu1 %v596_v52 }
 0x377   :  { %v502_v43 = vsel %vm501_vm11, %v965_v31, %v498_v14  ;;  %v690_v31 = vld [vmem:[%s1478_s13] sm:$0xff] }
 0x378   :  { %v507_v44 = vsel %vm504_vm12, %v506_v42, %v502_v43  ;;  %719 = vmatpush.msrb.mxu2 %v690_v31  ;;  %v817_v31 = vld [vmem:[%s1480_s15 + $0x10] sm:$0xff] }
 0x379   :  { %v515_v46 = vmul.f32 %v1303_v48, %v507_v44  ;;  %v595_v48 = vld [vmem:[%s1474_s9] sm:$0xff] }
 0x37a   :  { %624 = vmatpush.msrb.mxu1 %v595_v48 }
 0x37b   :  { %903 = vmatmul.msk.f32.gmra.mxu0 %vm323_vm8, %v515_v46 }
 0x3c0   :  { %v557_v47 = vpop.f32.mrf.mxu0 }
 0x3c1   :  { %v581_v56 = vmul.f32 %v557_v47, %v1186_v8  ;;  %v924_v47 = vld [vmem:[%s1476_s11] ss:$0 sm:$0xff] }
 0x3c8   :  { %v560_v49 = vpop.f32.mrf.mxu0 }
 0x3c9   :  { %v582_v1 = vmul.f32 %v560_v49, %v1194_v13 }
 0x3d0   :  { %v563_v51 = vpop.f32.mrf.mxu0 }
 0x3d1   :  { %v583_v55 = vmul.f32 %v563_v51, %v1204_v19 }
 0x3d3   :  { %v589_v58 = vadd.f32 %v583_v55, %v581_v56 }
 0x3d8   :  { %v566_v53 = vpop.f32.mrf.mxu0 }
 0x3d9   :  { %v584_v62 = vmul.f32 %v566_v53, %v1211_v21 }
 0x3db   :  { %v590_v30 = vadd.f32 %v584_v62, %v582_v1  ;;  %v827_v62 = vld [vmem:[%s1480_s15 + $0x60] sm:$0xff] }
 0x3e0   :  { %v569_v54 = vpop.f32.mrf.mxu0 }
 0x3e1   :  { %v585_v57 = vmul.f32 %v569_v54, %v1218_v23 }
 0x3e3   :  { %v591_v60 = vadd.f32 %v589_v58, %v585_v57  ;;  %v830_v58 = vld [vmem:[%s1480_s15 + $0x78] sm:$0xff] }
 0x3e4   :  { %835 = vmatpush.msra.mxu1 %v830_v58 }
 0x3e8   :  { %v572_v20 = vpop.f32.mrf.mxu0 }
 0x3e9   :  { %v586_v3 = vmul.f32 %v572_v20, %v1225_v25 }
 0x3eb   :  { %v592_v4 = vadd.f32 %v590_v30, %v586_v3  ;;  %v825_v30 = vld [vmem:[%s1480_s15 + $0x50] sm:$0xff] }
 0x3f0   :  { %v575_v59 = vpop.f32.mrf.mxu0 }
 0x3f1   :  { %v587_v61 = vmul.f32 %v575_v59, %v1232_v27  ;;  %v923_v27 = vld [vmem:[%s1475_s10] ss:$0 sm:$0xff]  ;;  %v829_v59 = vld [vmem:[%s1480_s15 + $0x70] sm:$0xff] }
 0x3f2   :  { %836 = vmatpush.msra.mxu1 %v829_v59 }
 0x3f3   :  { %v593_v63 = vadd.f32 %v591_v60, %v587_v61  ;;  %v828_v60 = vld [vmem:[%s1480_s15 + $0x68] sm:$0xff]  ;;  %v926_v61 = vld [vmem:[%s1479_s14] ss:$0 sm:$0xff] }
 0x3f4   :  { %837 = vmatpush.msra.mxu1 %v828_v60 }
 0x3f5   :  { %904 = vmatmul.msk.f32.vlgmr.msrb.gmra.mxu1 %vm67_vm0, %v593_v63  ;;  %v826_v63 = vld [vmem:[%s1480_s15 + $0x58] sm:$0xff] }
 0x3f6   :  { %838 = vmatpush.msra.mxu1 %v827_v62 }
 0x3f8   :  { %v578_v19 = vpop.f32.mrf.mxu0  ;;  %839 = vmatpush.msra.mxu1 %v826_v63 }
 0x3f9   :  { %v588_v8 = vmul.f32 %v578_v19, %v1239_v29 }
 0x3fa   :  { %840 = vmatpush.msra.mxu1 %v825_v30 }
 0x3fb   :  { %v594_v23 = vadd.f32 %v592_v4, %v588_v8  ;;  %v824_v4 = vld [vmem:[%s1480_s15 + $0x48] sm:$0xff] }
 0x3fc   :  { %841 = vmatpush.msra.mxu1 %v824_v4 }
 0x3fd   :  { %905 = vmatmul.msk.f32.gmra.mxu1 %vm67_vm0, %v594_v23  ;;  %v823_v23 = vld [vmem:[%s1480_s15 + $0x40] sm:$0xff] }
 0x3fe   :  { %842 = vmatpush.msra.mxu1 %v823_v23 }
 0x472   :  { %v626_v21 = vpop.f32.mrf.mxu1 }
 0x473   :  { %v627_v5 = vadd.f32 %v923_v27, %v626_v21  ;;  %v822_v21 = vld [vmem:[%s1480_s15 + $0x38] sm:$0xff] }
 0x474   :  { %843 = vmatpush.msra.mxu1 %v822_v21 }
 0x475   :  { %v1349_v13 = vadd.f32 %v627_v5, %v1107_v0 }
 0x477   :  { %v636_v25 = vsel %vm67_vm0, %v1349_v13, 0.0 }
 0x478   :  { %637 = vadd.xlane.f32.xlu2 %v636_v25 }
 0x47a   :  { %v629_v7 = vpop.f32.mrf.mxu1 }
 0x47b   :  { %v630_v9 = vadd.f32 %v923_v27, %v629_v7 }
 0x47d   :  { %v1354_v29 = vadd.f32 %v630_v9, %v1114_v2 }
 0x47f   :  { %v639_v11 = vsel %vm67_vm0, %v1354_v29, 0.0 }
 0x480   :  { %640 = vadd.xlane.f32.xlu0 %v639_v11  ;;  %v821_v11 = vld [vmem:[%s1480_s15 + $0x30] sm:$0xff] }
 0x481   :  { %844 = vmatpush.msra.mxu1 %v821_v11 }
 0x4eb   :  { %v638_v12 = vpop.xlane.xlu2 %637 }
 0x4ec   :  { %v642_v15 = vmul.f32 %v638_v12, %v1118_v10 }
 0x4ee   :  { %v644_v16 = vsub.f32 %v1349_v13, %v642_v15 }
 0x4f0   :  { %v646_v0 = vmul.f32 %v644_v16, %v644_v16 }
 0x4f2   :  { %v648_v17 = vsel %vm67_vm0, %v646_v0, 0.0 }
 0x4f3   :  { %649 = vadd.xlane.f32.xlu1 %v648_v17  ;;  %v641_v18 = vpop.xlane.xlu0 %640 }
 0x4f4   :  { %v643_v22 = vmul.f32 %v641_v18, %v1118_v10 }
 0x4f6   :  { %v645_v35 = vsub.f32 %v1354_v29, %v643_v22  ;;  %v819_v22 = vld [vmem:[%s1480_s15 + $0x20] sm:$0xff] }
 0x4f8   :  { %v647_v2 = vmul.f32 %v645_v35, %v645_v35 }
 0x4fa   :  { %v651_v24 = vsel %vm67_vm0, %v647_v2, 0.0 }
 0x4fb   :  { %652 = vadd.xlane.f32.xlu2 %v651_v24  ;;  %v818_v24 = vld [vmem:[%s1480_s15 + $0x18] sm:$0xff] }
 0x566   :  { %v650_v32 = vpop.xlane.xlu1 %649 }
 0x567   :  { %v654_v33 = vmul.f32 %v650_v32, %v1118_v10 }
 0x569   :  { %v656_v34 = vadd.f32 1e-05, %v654_v33 }
 0x56b   :  { %966 = vrsqrt.f32 %v656_v34  ;;  %vm664_vm13 = vweird.f32 %v656_v34 }
 0x56e   :  { %v653_v36 = vpop.xlane.xlu2 %652 }
 0x56f   :  { %v655_v37 = vmul.f32 %v653_v36, %v1118_v10  ;;  %v816_v36 = vld [vmem:[%s1480_s15 + $0x8] sm:$0xff] }
 0x571   :  { %v967_v38 = vpop.eup %966  ;;  %v657_v39 = vadd.f32 1e-05, %v655_v37 }
 0x572   :  { %v659_v40 = vmul.f32 %v967_v38, %v656_v34  ;;  %vm665_vm8 = vweird.f32 %v967_v38 }
 0x573   :  { %968 = vrsqrt.f32 %v657_v39  ;;  %vm666_vm14 = vmor %vm664_vm13, %vm665_vm8  ;;  %vm674_vm1 = vweird.f32 %v657_v39 }
 0x574   :  { %v660_v41 = vmul.f32 %v967_v38, %v659_v40 }
 0x576   :  { %v661_v14 = vmul.f32 0.5, %v660_v41 }
 0x578   :  { %v662_v42 = vsub.f32 1.5, %v661_v14 }
 0x579   :  { %v969_v43 = vpop.eup %968 }
 0x57a   :  { %v663_v44 = vmul.f32 %v967_v38, %v662_v42  ;;  %v669_v46 = vmul.f32 %v969_v43, %v657_v39  ;;  %vm675_vm15 = vweird.f32 %v969_v43  ;;  %v815_v39 = vld [vmem:[%s1480_s15] sm:$0xff] }
 0x57b   :  { %vm676_vm2 = vmor %vm674_vm1, %vm675_vm15 }
 0x57c   :  { %v667_v49 = vsel %vm666_vm14, %v967_v38, %v663_v44  ;;  %v670_v45 = vmul.f32 %v969_v43, %v669_v46 }
 0x57d   :  { %v678_v10 = vmul.f32 %v667_v49, %v644_v16  ;;  %v820_v16 = vld [vmem:[%s1480_s15 + $0x28] sm:$0xff] }
 0x57e   :  { %v671_v51 = vmul.f32 0.5, %v670_v45  ;;  %845 = vmatpush.msra.mxu1 %v820_v16 }
 0x57f   :  { %v683_v52 = vmul.f32 %v924_v47, %v678_v10 }
 0x580   :  { %v672_v48 = vsub.f32 1.5, %v671_v51  ;;  %846 = vmatpush.msra.mxu1 %v819_v22 }
 0x581   :  { %v688_v53 = vadd.f32 %v925_v50, %v683_v52 }
 0x582   :  { %v673_v54 = vmul.f32 %v969_v43, %v672_v48  ;;  %847 = vmatpush.msra.mxu1 %v818_v24 }
 0x583   :  { %906 = vmatmul.msk.f32.vlgmr.msrb.gmra.mxu2 %vm67_vm0, %v688_v53 }
 0x584   :  { %v677_v20 = vsel %vm676_vm2, %v969_v43, %v673_v54  ;;  %848 = vmatpush.msra.mxu1 %v817_v31 }
 0x585   :  { %v679_v55 = vmul.f32 %v677_v20, %v645_v35 }
 0x586   :  { %849 = vmatpush.msra.mxu1 %v816_v36 }
 0x587   :  { %v684_v56 = vmul.f32 %v924_v47, %v679_v55 }
 0x588   :  { %850 = vmatpush.msra.mxu1 %v815_v39 }
 0x589   :  { %v689_v57 = vadd.f32 %v925_v50, %v684_v56 }
 0x58b   :  { %907 = vmatmul.msk.f32.gmra.mxu2 %vm67_vm0, %v689_v57 }
 0x606   :  { %v721_v1 = vpop.f32.mrf.mxu2 }
 0x607   :  { %v1404_v3 = vadd.f32 %v926_v61, %v721_v1 }
 0x609   :  { %v1410_v19 = vmul.f32 0.70710677, %v1404_v3 }
 0x60b   :  { %v731_v8 = vmul.f32 %v1410_v19, %v1410_v19 }
 0x60d   :  { %v732_v27 = vmin.f32 %v731_v8, 16.0 }
 0x60e   :  { %v724_v5 = vpop.f32.mrf.mxu2 }
 0x60f   :  { %v733_v25 = vmul.f32 2.1237322e-06, %v732_v27  ;;  %v744_v7 = vmul.f32 3.8918573e-05, %v732_v27  ;;  %v1423_v9 = vadd.f32 %v926_v61, %v724_v5 }
 0x611   :  { %v734_v12 = vadd.f32 0.00028619796, %v733_v25  ;;  %v745_v15 = vadd.f32 0.001143296, %v744_v7  ;;  %v1432_v0 = vmul.f32 0.70710677, %v1423_v9 }
 0x612   :  { %v728_v36 = vmul.f32 0.5, %v1423_v9 }
 0x613   :  { %v735_v17 = vmul.f32 %v734_v12, %v732_v27  ;;  %v746_v18 = vmul.f32 %v745_v15, %v732_v27  ;;  %v771_v35 = vmul.f32 %v1432_v0, %v1432_v0 }
 0x615   :  { %v747_v2 = vadd.f32 0.014752088, %v746_v18  ;;  %v736_v6 = vadd.f32 0.0036580483, %v735_v17  ;;  %v772_v26 = vmin.f32 %v771_v35, 16.0 }
 0x617   :  { %v748_v28 = vmul.f32 %v747_v2, %v732_v27  ;;  %v773_v32 = vmul.f32 2.1237322e-06, %v772_v26  ;;  %v784_v33 = vmul.f32 3.8918573e-05, %v772_v26  ;;  %v737_v37 = vmul.f32 %v736_v6, %v732_v27 }
 0x618   :  { %v727_v2 = vmul.f32 0.5, %v1404_v3  ;;  %v927_v3 = vld [vmem:[%s1481_s16] ss:$0 sm:$0xff]  ;;  %s1002_s16 = smov 128  }
 0x619   :  { %v749_v34 = vadd.f32 0.112945676, %v748_v28  ;;  %v774_v38 = vadd.f32 0.00028619796, %v773_v32  ;;  %v785_v40 = vadd.f32 0.001143296, %v784_v33 }
 0x61a   :  { %v738_v44 = vadd.f32 0.05243302, %v737_v37 }
 0x61b   :  { %v750_v41 = vmul.f32 %v749_v34, %v732_v27  ;;  %v775_v14 = vmul.f32 %v774_v38, %v772_v26  ;;  %v786_v42 = vmul.f32 %v785_v40, %v772_v26 }
 0x61c   :  { %v739_v50 = vmul.f32 %v738_v44, %v732_v27 }
 0x61d   :  { %v751_v43 = vadd.f32 0.4994258, %v750_v41  ;;  %v787_v46 = vadd.f32 0.014752088, %v786_v42  ;;  %v776_v49 = vadd.f32 0.0036580483, %v775_v14 }
 0x61e   :  { %v740_v53 = vadd.f32 0.18741608, %v739_v50 }
 0x61f   :  { %v752_v47 = vmul.f32 %v751_v43, %v732_v27  ;;  %v788_v45 = vmul.f32 %v787_v46, %v772_v26  ;;  %v777_v52 = vmul.f32 %v776_v49, %v772_v26 }
 0x620   :  { %v741_v57 = vmul.f32 %v740_v53, %v732_v27 }
 0x621   :  { %v753_v10 = vadd.f32 1.0, %v752_v47  ;;  %v789_v51 = vadd.f32 0.112945676, %v788_v45  ;;  %v778_v20 = vadd.f32 0.05243302, %v777_v52 }
 0x622   :  { %v742_v63 = vadd.f32 1.1283791, %v741_v57 }
 0x623   :  { %970 = vrcp.f32 %v753_v10  ;;  %v790_v48 = vmul.f32 %v789_v51, %v772_v26  ;;  %v779_v60 = vmul.f32 %v778_v20, %v772_v26  ;;  %v765_v62 = vand.u32 2147483648, %v753_v10 }
 0x624   :  { %v763_v30 = vand.u32 2147483647, %v753_v10  ;;  %vm759_vm4 = vweird.f32 %v753_v10  ;;  %v743_v5 = vmul.f32 %v742_v63, %v1410_v19 }
 0x625   :  { %v791_v54 = vadd.f32 0.4994258, %v790_v48  ;;  %v780_v4 = vadd.f32 0.18741608, %v779_v60  ;;  %v766_v23 = vor.u32 1.1754944e-38, %v765_v62 }
 0x626   :  { %vm764_vm6 = vcmp.eq.f32.partialorder %v763_v30, 8.507059e+37 }
 0x627   :  { %v792_v55 = vmul.f32 %v791_v54, %v772_v26  ;;  %v781_v7 = vmul.f32 %v780_v4, %v772_v26 }
 0x629   :  { %v971_v56 = vpop.eup %970  ;;  %v793_v59 = vadd.f32 1.0, %v792_v55  ;;  %v782_v18 = vadd.f32 1.1283791, %v781_v7 }
 0x62a   :  { %v755_v58 = vmul.f32 %v971_v56, %v753_v10  ;;  %vm760_vm3 = vweird.f32 %v971_v56 }
 0x62b   :  { %972 = vrcp.f32 %v793_v59  ;;  %vm761_vm5 = vmor %vm759_vm4, %vm760_vm3  ;;  %v805_v17 = vand.u32 2147483648, %v793_v59  ;;  %v803_v35 = vand.u32 2147483647, %v793_v59  ;;  %vm799_vm9 = vweird.f32 %v793_v59 }
 0x62c   :  { %v756_v61 = vsub.f32 1.0, %v755_v58  ;;  %v783_v31 = vmul.f32 %v782_v18, %v1432_v0 }
 0x62d   :  { %v806_v19 = vor.u32 1.1754944e-38, %v805_v17  ;;  %vm804_vm11 = vcmp.eq.f32.partialorder %v803_v35, 8.507059e+37 }
 0x62e   :  { %v757_v1 = vmul.f32 %v971_v56, %v756_v61 }
 0x630   :  { %v758_v8 = vadd.f32 %v971_v56, %v757_v1 }
 0x631   :  { %v973_v21 = vpop.eup %972 }
 0x632   :  { %v762_v25 = vsel %vm761_vm5, %v971_v56, %v758_v8  ;;  %v795_v11 = vmul.f32 %v973_v21, %v793_v59  ;;  %vm800_vm7 = vweird.f32 %v973_v21 }
 0x633   :  { %v767_v27 = vsel %vm764_vm6, %v766_v23, %v762_v25  ;;  %vm801_vm10 = vmor %vm799_vm9, %vm800_vm7 }
 0x634   :  { %v768_v12 = vmul.f32 %v767_v27, %v743_v5  ;;  %v796_v15 = vsub.f32 1.0, %v795_v11 }
 0x636   :  { %v908_v16 = vclamps-f32 %v768_v12, 1.0  ;;  %v797_v22 = vmul.f32 %v973_v21, %v796_v15 }
 0x638   :  { %v811_v24 = vadd.f32 1.0, %v908_v16  ;;  %v798_v6 = vadd.f32 %v973_v21, %v797_v22 }
 0x63a   :  { %v813_v28 = vmul.f32 %v811_v24, %v727_v2  ;;  %v802_v26 = vsel %vm801_vm10, %v973_v21, %v798_v6 }
 0x63b   :  { %v807_v32 = vsel %vm804_vm11, %v806_v19, %v802_v26 }
 0x63c   :  { %851 = vmatmul.f32.vlgmr.msra.gmra.mxu1 %v813_v28  ;;  %v808_v33 = vmul.f32 %v807_v32, %v783_v31 }
 0x63e   :  { %v909_v34 = vclamps-f32 %v808_v33, 1.0 }
 0x640   :  { %v812_v37 = vadd.f32 1.0, %v909_v34 }
 0x642   :  { %v814_v38 = vmul.f32 %v812_v37, %v728_v36 }
 0x644   :  { %854 = vmatmul.f32.gmra.mxu1 %v814_v38 }
 0x6b9   :  { %v852_v39 = vpop.f32.mrf.mxu1 }
 0x6ba   :  { %v853_v40 = vadd.f32 %v927_v3, %v852_v39 }
 0x6bc   :  { %v858_v41 = vadd.f32 %v853_v40, %v1349_v13 }
 0x6be   :  { %860 = vst.msk [vmem:[#allocation2] sm:$0xff] %vm67_vm0, %v858_v41 }
 0x6c1   :  { %v855_v9 = vpop.f32.mrf.mxu1 }
 0x6c2   :  { %v856_v0 = vadd.f32 %v927_v3, %v855_v9 }
 0x6c4   :  { %v859_v14 = vadd.f32 %v856_v0, %v1354_v29 }
 0x6c6   :  { %861 = vst.msk [vmem:[#allocation2 + $0x8] sm:$0xff] %vm67_vm0, %v859_v14 }
 0x6c7   :  { %874 = dma.vmem_to_hbm [thread:$0]  %s867_s1, 256, %s869_s5, [#allocation3], %s1002_s16, %s1002_s16, %s1003_s23  }
 0x6c8   :  { %998 = dma.done.wait [#allocation3], 256  }
 0x6c9   :  { %999 = vsyncadd [#allocation3], 4294967040 }
 0x6ca   :  { %879 = vsyncpa [#allocation3], 1 }

</bundles_post_ra>
